<compile_context>
chip_gen: v6e
topology: v6e:2x2x1
jax: 0.10.0
libtpu: 0.0.40
codegen_flags: <defaults>
</compile_context>

<pallas_src>
import functools

import jax
import jax.numpy as jnp
from jax.experimental import pallas as pl
from jax.experimental.pallas import tpu as pltpu


# Sublane multiple required for a non-full block, by input itemsize.
_SUBLANE = {4: 8, 2: 16, 1: 32}


def _vmem_limit_bytes():
    """Per-generation scoped-VMEM budget (~60% of physical, capped at 96 MiB)."""
    physical = 64 * 1024 * 1024  # conservative fallback: v7x per-TC VMEM
    try:
        info = pltpu.get_tpu_info()
        for attr in ("vmem_capacity_bytes", "vmem_bytes", "vmem_size_bytes"):
            v = getattr(info, attr, None)
            if v:
                physical = int(v)
                break
    except Exception:
        pass
    return int(min(physical * 0.6, 96 * 1024 * 1024))


def _per_row_vmem_bytes(c, in_bytes):
    # 2 inputs x 2 double-buffers in the input dtype, plus ~5 live f32
    # full-tile temporaries inside the kernel body.
    return c * (2 * 2 * in_bytes + 5 * 4)


def _pick_tile_m(n, c, in_bytes, vmem_limit):
    sub = _SUBLANE[in_bytes]
    per_row = _per_row_vmem_bytes(c, in_bytes)
    tm = int(vmem_limit // per_row)
    if n <= tm:
        return n                     # single full-batch block (always legal)
    # Round to a multiple of 128: satisfies every dtype's sublane requirement
    # and keeps the lane-dense output slab 128-aligned.
    tm = max(sub, (tm // 128) * 128)
    return min(tm, n)


def _row_kl_kernel(s_ref, t_ref, o_ref, *, inv_temp, n_rows, tile_m):
    """Per-row KL(q || p) partial sums for one (tile_m, C) batch tile.

    p = softmax(s / T) (student, log space), q = softmax(t / T) (teacher).
    Emits one lane-dense (1, 1, tile_m) row of per-row KL values; the wrapper
    sums them and divides by the batch size ('batchmean').
    """
    ss = s_ref[...].astype(jnp.float32) * inv_temp
    tt = t_ref[...].astype(jnp.float32) * inv_temp

    # Student full log-sum-exp along classes (lane axis).
    s_max = jnp.max(ss, axis=1, keepdims=True)
    lse_s = s_max + jnp.log(jnp.sum(jnp.exp(ss - s_max), axis=1, keepdims=True))

    # Teacher: shifted exps, per-row softmax denominator, full log-sum-exp.
    t_max = jnp.max(tt, axis=1, keepdims=True)
    t_exp = jnp.exp(tt - t_max)
    t_sum = jnp.sum(t_exp, axis=1, keepdims=True)
    lse_t = t_max + jnp.log(t_sum)

    # KL(q || p) per row, simplified:
    #   sum_c q*(log q - log p) = sum_c q*(tt - ss) - (lse_t - lse_s)
    # with q = t_exp / t_sum applied as a single per-row reciprocal multiply.
    dot = jnp.sum(t_exp * (tt - ss), axis=1, keepdims=True)
    row_kl = dot * pl.reciprocal(t_sum) + (lse_s - lse_t)          # (tile_m, 1)

    # Mask rows past the true batch (partial last input tile holds junk data).
    row0 = pl.program_id(0) * tile_m
    row_ids = row0 + jax.lax.broadcasted_iota(jnp.int32, row_kl.shape, 0)
    masked = jnp.where(row_ids < n_rows, row_kl, 0.0)

    # Lane-dense writeback: one (1, 1, tile_m) slab per step (XLU relayout
    # instead of tile_m/8 masked vst.msk stores from a (tile_m, 1) column).
    o_ref[...] = masked.reshape(o_ref.shape)


def distillation_loss(s, t, temp=2.5, tile_m=None):
    """KLDivLoss(reduction='batchmean')(log_softmax(s/T, 1), softmax(t/T, 1))."""
    assert s.shape == t.shape and s.ndim == 2, (s.shape, t.shape)
    assert s.dtype == t.dtype, (s.dtype, t.dtype)
    n, c = s.shape
    in_bytes = jnp.dtype(s.dtype).itemsize
    sub = _SUBLANE[in_bytes]
    vmem_limit = _vmem_limit_bytes()

    per_row = _per_row_vmem_bytes(c, in_bytes)
    if sub * per_row > vmem_limit:
        # TODO(synk): vocab-scale C needs a class-dim streaming (online
        # logsumexp) kernel; refuse loudly instead of blowing scoped VMEM.
        raise ValueError(
            f"num_classes={c} too large for a single class-dim block "
            f"({sub * per_row} B minimum vs {vmem_limit} B VMEM budget)")

    if tile_m is None:
        tile_m = _pick_tile_m(n, c, in_bytes, vmem_limit)
    tile_m = min(int(tile_m), n)
    # Sublane constraint is dtype-dependent (bf16 needs multiples of 16).
    assert tile_m == n or tile_m % sub == 0, (tile_m, sub, s.dtype)
    n_tiles = pl.cdiv(n, tile_m)

    kernel = functools.partial(
        _row_kl_kernel, inv_temp=1.0 / float(temp), n_rows=n, tile_m=tile_m)

    cost = pl.CostEstimate(
        flops=int(10 * n * c),
        transcendentals=int(2 * n * c + 3 * n),
        bytes_accessed=int(2 * n * c * in_bytes + n_tiles * tile_m * 4),
    )

    row_kl = pl.pallas_call(
        kernel,
        out_shape=jax.ShapeDtypeStruct((n_tiles, 1, tile_m), jnp.float32),
        grid=(n_tiles,),
        in_specs=[
            pl.BlockSpec((tile_m, c), lambda i: (i, 0)),
            pl.BlockSpec((tile_m, c), lambda i: (i, 0)),
        ],
        out_specs=pl.BlockSpec((1, 1, tile_m), lambda i: (i, 0, 0)),
        compiler_params=pltpu.CompilerParams(
            dimension_semantics=("parallel",),
            vmem_limit_bytes=vmem_limit,
        ),
        cost_estimate=cost,
    )(s, t)

    # 'batchmean' reduction: tiny reduce left to XLA outside the kernel
    # (masked / padded rows are exactly 0).
    return jnp.sum(row_kl) / float(n)


def _reference(s, t, temp=2.5):
    log_p = jax.nn.log_softmax(s.astype(jnp.float32) / temp, axis=1)
    q = jax.nn.softmax(t.astype(jnp.float32) / temp, axis=1)
    return jnp.sum(q * (jnp.log(q) - log_p)) / s.shape[0]


if __name__ == "__main__":
    key = jax.random.PRNGKey(0)
    k1, k2, k3, k4 = jax.random.split(key, 4)

    # Primary test: batch=8, classes=32 (student / teacher logits), f32.
    s = jax.random.normal(k1, (8, 32), dtype=jnp.float32)
    t = jax.random.normal(k2, (8, 32), dtype=jnp.float32)
    loss = distillation_loss(s, t)
    jax.block_until_ready(loss)
    ref = _reference(s, t)
    assert jnp.allclose(loss, ref, atol=1e-5, rtol=1e-5), (loss, ref)

    # bf16-in-HBM path (kernel upcasts to f32 internally).
    sb, tb = s.astype(jnp.bfloat16), t.astype(jnp.bfloat16)
    loss_bf16 = distillation_loss(sb, tb)
    jax.block_until_ready(loss_bf16)
    ref_bf16 = _reference(sb.astype(jnp.float32), tb.astype(jnp.float32))
    assert jnp.allclose(loss_bf16, ref_bf16, atol=1e-3, rtol=1e-3), (loss_bf16, ref_bf16)

    # Multi-tile + partial-last-tile path (masking / pipelining / lane-dense
    # store exercised: 300 = 2*128 + 44).
    s2 = jax.random.normal(k3, (300, 256), dtype=jnp.float32)
    t2 = jax.random.normal(k4, (300, 256), dtype=jnp.float32)
    loss2 = distillation_loss(s2, t2, temp=1.7, tile_m=128)
    jax.block_until_ready(loss2)
    ref2 = _reference(s2, t2, temp=1.7)
    assert jnp.allclose(loss2, ref2, atol=1e-4, rtol=1e-4), (loss2, ref2)

    # Auto-picked tile (single full-batch block) on the same data.
    loss3 = distillation_loss(s2, t2, temp=1.7)
    jax.block_until_ready(loss3)
    assert jnp.allclose(loss3, ref2, atol=1e-4, rtol=1e-4), (loss3, ref2)

    print("KERNEL_OK")
</pallas_src>

<mosaic_0001>
module attributes {stable_mosaic.version = 11 : i64} {
  func.func @_row_kl_kernel(%arg0: i32, %arg1: memref<8x32xf32, #tpu.memory_space<vmem>>, %arg2: memref<8x32xf32, #tpu.memory_space<vmem>>, %arg3: memref<1x1x8xf32, #tpu.memory_space<vmem>>) attributes {dimension_semantics = [#tpu.dimension_semantics<parallel>], iteration_bounds = array<i64: 1>, scalar_prefetch = 0 : i64, scratch_operands = 0 : i64, tpu.core_type = #tpu.core_type<tc>, window_params = [{transform_indices = @transform_0, window_bounds = array<i64: 8, 32>}, {transform_indices = @transform_1, window_bounds = array<i64: 8, 32>}, {transform_indices = @transform_2, window_bounds = array<i64: 1, 1, 8>}]} {
    %c0 = arith.constant 0 : index
    %c0_0 = arith.constant 0 : index
    %0 = vector.load %arg1[%c0, %c0_0] : memref<8x32xf32, #tpu.memory_space<vmem>>, vector<8x32xf32>
    %cst = arith.constant 4.000000e-01 : f32
    %1 = vector.broadcast %cst : f32 to vector<8x32xf32>
    %2 = arith.mulf %0, %1 : vector<8x32xf32>
    %c0_1 = arith.constant 0 : index
    %c0_2 = arith.constant 0 : index
    %3 = vector.load %arg2[%c0_1, %c0_2] : memref<8x32xf32, #tpu.memory_space<vmem>>, vector<8x32xf32>
    %cst_3 = arith.constant 4.000000e-01 : f32
    %4 = vector.broadcast %cst_3 : f32 to vector<8x32xf32>
    %5 = arith.mulf %3, %4 : vector<8x32xf32>
    %cst_4 = arith.constant dense<0xFF800000> : vector<8xf32>
    %6 = vector.multi_reduction <maximumf>, %2, %cst_4 [1] : vector<8x32xf32> to vector<8xf32>
    %7 = vector.shape_cast %6 : vector<8xf32> to vector<8x1xf32>
    %8 = vector.broadcast %7 : vector<8x1xf32> to vector<8x32xf32>
    %9 = arith.subf %2, %8 : vector<8x32xf32>
    %10 = math.exp %9 : vector<8x32xf32>
    %cst_5 = arith.constant dense<0.000000e+00> : vector<8xf32>
    %11 = vector.multi_reduction <add>, %10, %cst_5 [1] : vector<8x32xf32> to vector<8xf32>
    %12 = vector.shape_cast %11 : vector<8xf32> to vector<8x1xf32>
    %13 = math.log %12 : vector<8x1xf32>
    %14 = arith.addf %7, %13 : vector<8x1xf32>
    %cst_6 = arith.constant dense<0xFF800000> : vector<8xf32>
    %15 = vector.multi_reduction <maximumf>, %5, %cst_6 [1] : vector<8x32xf32> to vector<8xf32>
    %16 = vector.shape_cast %15 : vector<8xf32> to vector<8x1xf32>
    %17 = vector.broadcast %16 : vector<8x1xf32> to vector<8x32xf32>
    %18 = arith.subf %5, %17 : vector<8x32xf32>
    %19 = math.exp %18 : vector<8x32xf32>
    %cst_7 = arith.constant dense<0.000000e+00> : vector<8xf32>
    %20 = vector.multi_reduction <add>, %19, %cst_7 [1] : vector<8x32xf32> to vector<8xf32>
    %21 = vector.shape_cast %20 : vector<8xf32> to vector<8x1xf32>
    %22 = math.log %21 : vector<8x1xf32>
    %23 = arith.addf %16, %22 : vector<8x1xf32>
    %24 = arith.subf %5, %2 : vector<8x32xf32>
    %25 = arith.mulf %19, %24 : vector<8x32xf32>
    %cst_8 = arith.constant dense<0.000000e+00> : vector<8xf32>
    %26 = vector.multi_reduction <add>, %25, %cst_8 [1] : vector<8x32xf32> to vector<8xf32>
    %27 = vector.shape_cast %26 : vector<8xf32> to vector<8x1xf32>
    %28 = tpu.reciprocal %21 : vector<8x1xf32> -> vector<8x1xf32>
    %29 = arith.mulf %27, %28 : vector<8x1xf32>
    %30 = arith.subf %14, %23 : vector<8x1xf32>
    %31 = arith.addf %29, %30 : vector<8x1xf32>
    %c8_i32 = arith.constant 8 : i32
    %32 = arith.muli %arg0, %c8_i32 : i32
    %33 = tpu.iota {dimensions = array<i32: 0>} : vector<8x1xi32>
    %34 = vector.broadcast %32 : i32 to vector<8x1xi32>
    %35 = arith.addi %34, %33 : vector<8x1xi32>
    %c8_i32_9 = arith.constant 8 : i32
    %36 = vector.broadcast %c8_i32_9 : i32 to vector<8x1xi32>
    %37 = arith.cmpi slt, %35, %36 : vector<8x1xi32>
    %cst_10 = arith.constant 0.000000e+00 : f32
    %38 = vector.broadcast %cst_10 : f32 to vector<8x1xf32>
    %39 = arith.select %37, %31, %38 : vector<8x1xi1>, vector<8x1xf32>
    %40 = vector.shape_cast %39 : vector<8x1xf32> to vector<1x1x8xf32>
    %c0_11 = arith.constant 0 : index
    %c0_12 = arith.constant 0 : index
    %c0_13 = arith.constant 0 : index
    %41 = vector.load %arg3[%c0_11, %c0_12, %c0_13] : memref<1x1x8xf32, #tpu.memory_space<vmem>>, vector<1x1x8xf32>
    tpu.vector_store %arg3[%c0_11, %c0_12, %c0_13], %40 {strides = array<i32>} : memref<1x1x8xf32, #tpu.memory_space<vmem>>, vector<1x1x8xf32>,
    return
  }
  func.func @transform_0(%arg0: i32) -> (i32, i32) {
    %c0_i32 = arith.constant 0 : i32
    %c0_i32_0 = arith.constant 0 : i32
    return %arg0, %c0_i32 : i32, i32
  }
  func.func @transform_1(%arg0: i32) -> (i32, i32) {
    %c0_i32 = arith.constant 0 : i32
    %c0_i32_0 = arith.constant 0 : i32
    return %arg0, %c0_i32 : i32, i32
  }
  func.func @transform_2(%arg0: i32) -> (i32, i32, i32) {
    %c0_i32 = arith.constant 0 : i32
    %c0_i32_0 = arith.constant 0 : i32
    %c0_i32_1 = arith.constant 0 : i32
    return %arg0, %c0_i32, %c0_i32_0 : i32, i32, i32
  }
}

</mosaic_0001>

<bundles_post_ra>
// kernel: tpu_custom_call.1
= control target key start
LH: loop header
LB: loop body
LE: loop exit
PB: predicated region body
PF: predicated region fallthrough
CT: control target
= control target key end

     0   :  { %7 = vsyncpa [#allocation3], 0  ;;  %s218_s0 = inlined_call_operand.hbm [shape: f32[8,32], index: 0, kind: input, shape index: {}]   ;;  %s219_s1 = inlined_call_operand.hbm [shape: f32[8,32], index: 1, kind: input, shape index: {}]   ;;  %s220_s2 = inlined_call_operand.hbm [shape: f32[1,1,8], index: 2, kind: output, shape index: {}]  }
   0x1   :  { %8 = vsyncpa [#allocation6], 0 }
   0x2   :  { %9 = vsyncpa [#allocation4], 0  ;;  %s186_s9 = smov [#allocation2]   ;;  %s187_s11 = smov [#allocation5]  }
   0x3   :  { %s16_s10 = sshll.u32 %s186_s9, 4  ;;  %s26_s12 = sshll.u32 %s187_s11, 4  ;;  %s17_s10 = int_to_ptr.vmem [resolvable:$true] %s16_s10  ;;  %s27_s12 = int_to_ptr.vmem [resolvable:$true] %s26_s12 }
   0x4   :  { %s128_s13 = scalar_lea.vmem %s17_s10, 128  ;;  %p133_p1 = scmp.lt.s32.totalorder %s17_s10, %s17_s10 }
   0x5   :  { %p129_p0 = scmp.ne.s32.totalorder %s17_s10, %s128_s13  ;;  %p134_p2 = scmp.lt.s32.totalorder %s128_s13, %s128_s13 }
   0x7   :  { %p135_p3 = por %p134_p2, %p133_p1 }
   0x9   :  { %p136_p4 = pnand %p135_p3, %p129_p0 }
   0xb   :  { %139 = shalt.err (!%p136_p4)
}
   0xc   :  { %19 = dma.hbm_to_vmem [thread:$0]  %s218_s0, 128, %s17_s10, [#allocation3]  }
   0xd   :  { %s148_s16 = scalar_lea.vmem %s27_s12, 128  ;;  %p153_p6 = scmp.lt.s32.totalorder %s27_s12, %s27_s12 }
   0xe   :  { %p149_p5 = scmp.ne.s32.totalorder %s27_s12, %s148_s16  ;;  %p154_p7 = scmp.lt.s32.totalorder %s148_s16, %s148_s16 }
  0x10   :  { %p155_p8 = por %p154_p7, %p153_p6 }
  0x12   :  { %p156_p9 = pnand %p155_p8, %p149_p5 }
  0x14   :  { %159 = shalt.err (!%p156_p9)
}
  0x15   :  { %29 = dma.hbm_to_vmem [thread:$0]  %s219_s1, 128, %s27_s12, [#allocation6]  }
  0x16   :  { %180 = dma.done.wait [#allocation3], 128  }
  0x17   :  { %181 = vsyncadd [#allocation3], 4294967168 }
  0x18   :  { %182 = dma.done.wait [#allocation6], 128  }
  0x19   :  { %183 = vsyncadd [#allocation6], 4294967168  ;;  %v36_v0 = vld [vmem:[#allocation2] sm:$0xff]  ;;  %vm40_vm0 = vcmask 261120   ;;  %v38_v1 = vld [vmem:[#allocation5] sm:$0xff]  ;;  %v82_v22 = vlaneseq  ;;  %s188_s0 = smov [#allocation7]  }
  0x1a   :  { %v37_v2 = vmul.f32 0.4, %v36_v0  ;;  %v39_v3 = vmul.f32 0.4, %v38_v1  ;;  %s97_s1 = sshll.u32 %s188_s0, 4  ;;  %vm89_vm1 = vcmask 57344   ;;  %s98_s1 = int_to_ptr.vmem [resolvable:$true] %s97_s1 }
  0x1b   :  { %v83_v26 = vand.u32 127, %v82_v22  ;;  %v85_v27 = vshrl.u32 %v82_v22, 7  ;;  %s160_s19 = scalar_lea.vmem %s98_s1, 16  ;;  %s164_s20 = scalar_lea.vmem %s98_s1, 32 }
  0x1c   :  { %v41_v4 = vsel %vm40_vm0, %v37_v2, -inf  ;;  %v53_v5 = vsel %vm40_vm0, %v39_v3, -inf  ;;  %v65_v14 = vsub.f32 %v39_v3, %v37_v2  ;;  %p161_p10 = scmp.ne.s32.totalorder %s98_s1, %s160_s19  ;;  %p165_p11 = scmp.lt.s32.totalorder %s98_s1, %s98_s1 }
  0x1d   :  { %42 = vmax.xlane.f32.xlu0 %v41_v4  ;;  %v86_v32 = vsub.s32 %v83_v26, %v85_v27  ;;  %p166_p12 = scmp.lt.s32.totalorder %s164_s20, %s160_s19 }
  0x1f   :  { %p167_p13 = por %p166_p12, %p165_p11 }
  0x21   :  { %54 = vmax.xlane.f32.xlu0 %v53_v5  ;;  %p168_p0 = pnand %p167_p13, %p161_p10 }
  0xa6   :  { %v43_v6 = vpop.xlane.xlu0 %42 }
  0xa7   :  { %v44_v7 = vsub.f32 %v37_v2, %v43_v6 }
  0xa9   :  { %v45_v8 = vmul.f32 1.442695, %v44_v7 }
  0xaa   :  { %v55_v9 = vpop.xlane.xlu0 %54 }
  0xab   :  { %110 = vpow2.f32 %v45_v8  ;;  %v56_v10 = vsub.f32 %v39_v3, %v55_v9 }
  0xad   :  { %v57_v11 = vmul.f32 1.442695, %v56_v10 }
  0xaf   :  { %112 = vpow2.f32 %v57_v11 }
  0xb8   :  { %v111_v12 = vpop.eup %110 }
  0xb9   :  { %v47_v13 = vsel %vm40_vm0, %v111_v12, 0.0 }
  0xba   :  { %48 = vadd.xlane.f32.xlu1 %v47_v13 }
  0xbc   :  { %v113_v15 = vpop.eup %112 }
  0xbd   :  { %v59_v16 = vsel %vm40_vm0, %v113_v15, 0.0  ;;  %v66_v17 = vmul.f32 %v113_v15, %v65_v14 }
  0xbe   :  { %60 = vadd.xlane.f32.xlu1 %v59_v16 }
  0xbf   :  { %v67_v18 = vsel %vm40_vm0, %v66_v17, 0.0 }
  0xc0   :  { %68 = vadd.xlane.f32.xlu0 %v67_v18 }
 0x143   :  { %v49_v19 = vpop.xlane.xlu1 %48 }
 0x144   :  { %114 = vlog2.f32 %v49_v19 }
 0x147   :  { %v61_v20 = vpop.xlane.xlu1 %60 }
 0x148   :  { %116 = vlog2.f32 %v61_v20 }
 0x149   :  { %118 = vrcp.f32 %v61_v20  ;;  %v69_v31 = vpop.xlane.xlu0 %68 }
 0x151   :  { %v115_v21 = vpop.eup %114 }
 0x152   :  { %v51_v23 = vmul.f32 0.6931472, %v115_v21 }
 0x154   :  { %v52_v29 = vadd.f32 %v51_v23, %v43_v6 }
 0x155   :  { %v117_v24 = vpop.eup %116 }
 0x156   :  { %v63_v25 = vmul.f32 0.6931472, %v117_v24  ;;  %v119_v28 = vpop.eup %118 }
 0x157   :  { %v71_v33 = vmul.f32 %v119_v28, %v69_v31 }
 0x158   :  { %v64_v30 = vadd.f32 %v63_v25, %v55_v9 }
 0x15a   :  { %v72_v34 = vsub.f32 %v52_v29, %v64_v30 }
 0x15c   :  { %v73_v35 = vadd.f32 %v72_v34, %v71_v33 }
 0x15e   :  { %v87_v36 = vrot.slane %v73_v35, %v86_v32 }
 0x160   :  { %90 = vst.msk [vmem:[#allocation7] sm:$0x1] %vm89_vm1, %v87_v36 }
 0x161   :  { %171 = shalt.err (!%p168_p0)
}
 0x162   :  { %100 = dma.vmem_to_hbm [thread:$0]  %s98_s1, 16, %s220_s2, [#allocation4]  }
 0x163   :  { %184 = dma.done.wait [#allocation4], 16  }
 0x164   :  { %185 = vsyncadd [#allocation4], 4294967280 }
 0x165   :  { %104 = vsyncpa [#allocation3], 1 }
 0x166   :  { %105 = vsyncpa [#allocation6], 1 }
 0x167   :  { %106 = vsyncpa [#allocation4], 1 }

</bundles_post_ra>
